<compile_context>
chip_gen: v7x
topology: tpu7x:2x2x1
jax: 0.10.0
libtpu: 0.0.40
codegen_flags: <defaults>
</compile_context>

<pallas_src>
import functools

import jax
import jax.numpy as jnp
import numpy as np
from jax.experimental import pallas as pl
from jax.experimental.pallas import tpu as pltpu

_LANE = 128
_SUBLANE = 8

_MIN_BLOCK_BYTES = 512 << 10      # below this, per-step overhead exceeds ~10%
_MAX_BLOCK_BYTES = 8 << 20        # per-block cap; 4x (in+out, double-buffered)
                                  # stays under the scoped VMEM limit below
_MIN_GRID_STEPS = 8               # keep enough parallel steps for v7x megacore
_VMEM_LIMIT_BYTES = 44 << 20      # past the 16/32 MiB default scoped limits,
                                  # safely below v7x's 64 MiB physical VMEM
_BYPASS_BYTES = 256 << 10         # tiny inputs: let XLA fuse the activation

_target_block_bytes_cache = None


def _target_block_bytes():
    """~4 MiB blocks on v5e/v6e, ~8 MiB on v7x (higher HBM BW)."""
    global _target_block_bytes_cache
    if _target_block_bytes_cache is None:
        tgt = 4 << 20
        try:
            vmem = pltpu.get_tpu_info().vmem_capacity_bytes
            if vmem <= (64 << 20):          # v7x: 64 MiB VMEM/TC, ~3.2 TB/s HBM
                tgt = 8 << 20
        except Exception:
            pass
        _target_block_bytes_cache = tgt
    return _target_block_bytes_cache


def _pick_block_bytes(total_bytes):
    # Keep >= ~_MIN_GRID_STEPS grid steps (megacore / pipelining) but never
    # shrink blocks below _MIN_BLOCK_BYTES (per-step overhead).
    capped = max(total_bytes // _MIN_GRID_STEPS, _MIN_BLOCK_BYTES)
    return max(_MIN_BLOCK_BYTES, min(_target_block_bytes(), capped))


def _compiler_params(dim_sem):
    return pltpu.CompilerParams(
        dimension_semantics=dim_sem,
        vmem_limit_bytes=_VMEM_LIMIT_BYTES,
    )


# ----------------------------------------------------------------------------
# Kernels
# ----------------------------------------------------------------------------
def _elementwise_kernel(x_ref, o_ref, *, act, alpha):
    x = x_ref[...]
    if act == "lk_relu":
        y = jnp.where(x >= 0, x, alpha * x)
    elif act == "relu":
        y = jnp.maximum(x, 0)
    elif act == "sigmoid":
        y = 1.0 / (1.0 + jnp.exp(-x))
    elif act == "tanh":
        y = jnp.tanh(x)
    else:
        y = x
    o_ref[...] = y.astype(o_ref.dtype)


def _softmax_kernel(x_ref, o_ref, *, axis):
    # Numerically stable softmax over `axis` of the block, f32 accumulation.
    # approx=False keeps the denominator exact (matches jax.nn.softmax at
    # rtol=1e-5); the kernel is HBM-BW-bound, so the exact divide is free.
    x = x_ref[...].astype(jnp.float32)
    m = jnp.max(x, axis=axis, keepdims=True)
    e = jnp.exp(x - m)
    s = jnp.sum(e, axis=axis, keepdims=True)
    o_ref[...] = (e * pl.reciprocal(s, approx=False)).astype(o_ref.dtype)


# ----------------------------------------------------------------------------
# Plain-JAX fallbacks (tiny inputs / shapes where a standalone kernel loses)
# ----------------------------------------------------------------------------
def _elementwise_jnp(x, act, alpha):
    if act == "lk_relu":
        return jnp.where(x >= 0, x, alpha * x)
    if act == "relu":
        return jnp.maximum(x, 0)
    if act == "sigmoid":
        return jax.nn.sigmoid(x)
    if act == "tanh":
        return jnp.tanh(x)
    return x


# ----------------------------------------------------------------------------
# Pallas wrappers (layout plumbing only -- no pad/slice HBM passes)
# ----------------------------------------------------------------------------
def _elementwise_pallas(x, act, alpha):
    n = int(x.size)
    itemsize = jnp.dtype(x.dtype).itemsize

    # Wide lane-dense slab when a 128-multiple divisor exists; otherwise keep
    # the array's own trailing dim on lanes (full-extent last block dim is
    # always legal) -- never pad/copy.
    cols = 0
    for c in (1024, 512, 256, 128):
        if n % c == 0:
            cols = c
            break
    if cols == 0:
        cols = int(x.shape[-1]) if x.ndim >= 2 else n
    rows = n // cols

    # One row block would already blow the VMEM budget -> leave it to XLA.
    if min(rows, _SUBLANE) * cols * itemsize > _MAX_BLOCK_BYTES:
        return _elementwise_jnp(x, act, alpha)

    x2 = x.reshape(rows, cols)

    blk_bytes = _pick_block_bytes(n * itemsize)
    target_rows = max(
        _SUBLANE, (blk_bytes // (cols * itemsize)) // _SUBLANE * _SUBLANE
    )
    block_rows = int(min(rows, target_rows))   # mult of 8, or full row extent

    grid = (pl.cdiv(rows, block_rows),)        # trailing partial block masked
    kernel = functools.partial(_elementwise_kernel, act=act, alpha=alpha)
    out2 = pl.pallas_call(
        kernel,
        out_shape=jax.ShapeDtypeStruct((rows, cols), x.dtype),
        grid_spec=pltpu.PrefetchScalarGridSpec(
            num_scalar_prefetch=0,
            grid=grid,
            in_specs=[pl.BlockSpec((block_rows, cols), lambda i: (i, 0))],
            out_specs=pl.BlockSpec((block_rows, cols), lambda i: (i, 0)),
        ),
        compiler_params=_compiler_params(("parallel",)),
    )(x2)
    return out2.reshape(x.shape)


def _softmax_pallas(x, dim):
    shape = x.shape
    C = int(shape[dim])
    pre = int(np.prod(shape[:dim], dtype=np.int64)) if dim > 0 else 1
    post = (
        int(np.prod(shape[dim + 1:], dtype=np.int64))
        if dim + 1 < len(shape)
        else 1
    )
    itemsize = jnp.dtype(x.dtype).itemsize
    total_bytes = pre * C * max(post, 1) * itemsize
    blk_bytes = _pick_block_bytes(total_bytes)

    if post > 1:
        # Keep the (often small) softmax axis C on sublanes, trailing spatial
        # extent on lanes; reduce over axis=-2.  No HBM-level transposes or
        # pads for NCHW inputs.  Fold several `pre` slices per block so small
        # C doesn't degenerate into hundreds of tiny grid steps.
        x3 = x.reshape(pre, C, post)

        lane_tgt = max(
            _LANE, (blk_bytes // (C * itemsize)) // _LANE * _LANE
        )
        if post % _LANE == 0:
            tw = min(post, lane_tgt)
        elif C * post * itemsize <= _MAX_BLOCK_BYTES:
            tw = post                       # full-extent lanes: legal, no pad
        else:
            # lane-tile the post axis; trailing partial block is mask-stored
            # (softmax reduces over C, so masked lanes never contaminate).
            tw = min(lane_tgt, max(_LANE, post // _LANE * _LANE))
            if C * tw * itemsize > _MAX_BLOCK_BYTES:
                # even one lane tile of C rows is too big for the VMEM budget
                return jax.nn.softmax(x, axis=dim)

        per_slice = C * tw * itemsize
        P = int(max(1, min(pre, blk_bytes // max(per_slice, 1))))

        grid = (pl.cdiv(pre, P), pl.cdiv(post, tw))
        kernel = functools.partial(_softmax_kernel, axis=-2)
        out3 = pl.pallas_call(
            kernel,
            out_shape=jax.ShapeDtypeStruct((pre, C, post), x.dtype),
            grid_spec=pltpu.PrefetchScalarGridSpec(
                num_scalar_prefetch=0,
                grid=grid,
                in_specs=[pl.BlockSpec((P, C, tw), lambda i, j: (i, 0, j))],
                out_specs=pl.BlockSpec((P, C, tw), lambda i, j: (i, 0, j)),
            ),
            compiler_params=_compiler_params(("parallel", "parallel")),
        )(x3)
        return out3.reshape(shape)

    # Softmax axis is innermost: (pre, C) rows, reduce over lanes.
    if min(pre, _SUBLANE) * C * itemsize > _MAX_BLOCK_BYTES:
        # TODO(synk): online-softmax (running max/sum) tiling over C for
        # vocab-sized rows; fall back to XLA for now.
        return jax.nn.softmax(x, axis=dim)

    x2 = x.reshape(pre, C)
    tr_target = max(
        _SUBLANE,
        (blk_bytes // (max(C, 1) * itemsize)) // _SUBLANE * _SUBLANE,
    )
    tr = int(min(pre, tr_target))
    grid = (pl.cdiv(pre, tr),)
    kernel = functools.partial(_softmax_kernel, axis=-1)
    out2 = pl.pallas_call(
        kernel,
        out_shape=jax.ShapeDtypeStruct((pre, C), x.dtype),
        grid_spec=pltpu.PrefetchScalarGridSpec(
            num_scalar_prefetch=0,
            grid=grid,
            in_specs=[pl.BlockSpec((tr, C), lambda i: (i, 0))],
            out_specs=pl.BlockSpec((tr, C), lambda i: (i, 0)),
        ),
        compiler_params=_compiler_params(("parallel",)),
    )(x2)
    return out2.reshape(shape)


# ----------------------------------------------------------------------------
# Public forward
# ----------------------------------------------------------------------------
_SUPPORTED = ("lk_relu", "relu", "softmax", "sigmoid", "tanh")


def _legacy_softmax_dim(ndim):
    # nn.Softmax() with no dim -> PyTorch legacy: dim=0 for 0/1/3-D, else 1
    return 0 if ndim in (0, 1, 3) else 1


def activation_layer(x, activation="lk_relu", alpha_relu=0.15):
    """Forward pass of ActivationLayer."""
    if activation not in _SUPPORTED:
        return x  # self.activation is None -> identity

    if x.ndim == 0:
        if activation == "softmax":
            return jnp.ones_like(x)
        return _elementwise_jnp(x, activation, alpha_relu)

    # Tiny inputs: pallas_call launch + per-step overhead dominates and XLA
    # can fuse the activation into its producer.
    if x.size * jnp.dtype(x.dtype).itemsize < _BYPASS_BYTES:
        if activation == "softmax":
            return jax.nn.softmax(x, axis=_legacy_softmax_dim(x.ndim))
        return _elementwise_jnp(x, activation, alpha_relu)

    if activation == "softmax":
        return _softmax_pallas(x, _legacy_softmax_dim(x.ndim))
    return _elementwise_pallas(x, activation, alpha_relu)


# ----------------------------------------------------------------------------
# Main
# ----------------------------------------------------------------------------
if __name__ == "__main__":
    key = jax.random.PRNGKey(0)
    x = jax.random.normal(key, (2, 4, 16, 16), dtype=jnp.float32)  # NCHW

    # default config of ActivationLayer: LeakyReLU(alpha=0.15)
    out = jax.block_until_ready(activation_layer(x, "lk_relu", 0.15))
    ref = jnp.where(x >= 0, x, 0.15 * x)
    assert out.shape == x.shape and out.dtype == x.dtype
    np.testing.assert_allclose(np.asarray(out), np.asarray(ref),
                               rtol=1e-6, atol=1e-6)

    # other elementwise branches
    for act in ("relu", "sigmoid", "tanh"):
        o = jax.block_until_ready(activation_layer(x, act))
        r = {"relu": jnp.maximum(x, 0.0),
             "sigmoid": jax.nn.sigmoid(x),
             "tanh": jnp.tanh(x)}[act]
        np.testing.assert_allclose(np.asarray(o), np.asarray(r),
                                   rtol=1e-5, atol=1e-6)

    # softmax: nn.Softmax() legacy dim -> dim=1 for 4-D input
    o = jax.block_until_ready(activation_layer(x, "softmax"))
    r = jax.nn.softmax(x, axis=1)
    np.testing.assert_allclose(np.asarray(o), np.asarray(r),
                               rtol=1e-5, atol=1e-6)

    # identity branch (activation=None)
    o = jax.block_until_ready(activation_layer(x, "none"))
    np.testing.assert_allclose(np.asarray(o), np.asarray(x))

    # larger case: exercises the multi-step, pipelined Pallas grids
    xb = jax.random.normal(jax.random.PRNGKey(1), (8, 64, 32, 32),
                           dtype=jnp.float32)
    ob = jax.block_until_ready(activation_layer(xb, "lk_relu", 0.15))
    rb = jnp.where(xb >= 0, xb, 0.15 * xb)
    np.testing.assert_allclose(np.asarray(ob), np.asarray(rb),
                               rtol=1e-6, atol=1e-6)
    ob = jax.block_until_ready(activation_layer(xb, "softmax"))
    rb = jax.nn.softmax(xb, axis=1)
    np.testing.assert_allclose(np.asarray(ob), np.asarray(rb),
                               rtol=1e-5, atol=1e-6)

    # non-128-divisible size: exercises the no-pad full-extent-lane layouts
    xo = jax.random.normal(jax.random.PRNGKey(2), (3, 5, 70, 90),
                           dtype=jnp.float32)
    oo = jax.block_until_ready(activation_layer(xo, "lk_relu", 0.15))
    ro = jnp.where(xo >= 0, xo, 0.15 * xo)
    np.testing.assert_allclose(np.asarray(oo), np.asarray(ro),
                               rtol=1e-6, atol=1e-6)
    oo = jax.block_until_ready(activation_layer(xo, "softmax"))
    ro = jax.nn.softmax(xo, axis=1)
    np.testing.assert_allclose(np.asarray(oo), np.asarray(ro),
                               rtol=1e-5, atol=1e-6)

    print("KERNEL_OK")
</pallas_src>

<mosaic_0001>
module attributes {stable_mosaic.version = 11 : i64} {
  func.func @_elementwise_kernel(%arg0: i32, %arg1: memref<128x1024xf32, #tpu.memory_space<vmem>>, %arg2: memref<128x1024xf32, #tpu.memory_space<vmem>>) attributes {dimension_semantics = [#tpu.dimension_semantics<parallel>], iteration_bounds = array<i64: 4>, scalar_prefetch = 0 : i64, scratch_operands = 0 : i64, tpu.core_type = #tpu.core_type<tc>, window_params = [{transform_indices = @transform_0, window_bounds = array<i64: 128, 1024>}, {transform_indices = @transform_1, window_bounds = array<i64: 128, 1024>}]} {
    %c0 = arith.constant 0 : index
    %c0_0 = arith.constant 0 : index
    %0 = vector.load %arg1[%c0, %c0_0] : memref<128x1024xf32, #tpu.memory_space<vmem>>, vector<128x1024xf32>
    %cst = arith.constant 0.000000e+00 : f32
    %1 = vector.broadcast %cst : f32 to vector<128x1024xf32>
    %2 = arith.cmpf oge, %0, %1 : vector<128x1024xf32>
    %cst_1 = arith.constant 1.500000e-01 : f32
    %3 = vector.broadcast %cst_1 : f32 to vector<128x1024xf32>
    %4 = arith.mulf %3, %0 : vector<128x1024xf32>
    %5 = arith.select %2, %0, %4 : vector<128x1024xi1>, vector<128x1024xf32>
    %c0_2 = arith.constant 0 : index
    %c0_3 = arith.constant 0 : index
    %6 = vector.load %arg2[%c0_2, %c0_3] : memref<128x1024xf32, #tpu.memory_space<vmem>>, vector<128x1024xf32>
    tpu.vector_store %arg2[%c0_2, %c0_3], %5 {strides = array<i32>} : memref<128x1024xf32, #tpu.memory_space<vmem>>, vector<128x1024xf32>,
    return
  }
  func.func @transform_0(%arg0: i32) -> (i32, i32) {
    %c0_i32 = arith.constant 0 : i32
    %c0_i32_0 = arith.constant 0 : i32
    return %arg0, %c0_i32 : i32, i32
  }
  func.func @transform_1(%arg0: i32) -> (i32, i32) {
    %c0_i32 = arith.constant 0 : i32
    %c0_i32_0 = arith.constant 0 : i32
    return %arg0, %c0_i32 : i32, i32
  }
}

</mosaic_0001>

<bundles_post_ra>
// kernel: tpu_custom_call.1
= control target key start
LH: loop header
LB: loop body
LE: loop exit
PB: predicated region body
PF: predicated region fallthrough
CT: control target
= control target key end

     0   :  { %6 = vsyncpa [#allocation3], 0  ;;  %s1532_s0 = inlined_call_operand.hbm [shape: f32[512,1024], index: 0, kind: input, shape index: {}]   ;;  %s1533_s1 = inlined_call_operand.hbm [shape: f32[512,1024], index: 1, kind: output, shape index: {}]  }
   0x1   :  { %8 = vsyncpa [#allocation3 + $0x1], 0 }
   0x2   :  { %9 = vsyncpa [#allocation4], 0 }
   0x3   :  { %11 = vsyncpa [#allocation4 + $0x1], 0  ;;  %s1050_s6 = smov 0   ;;  %s1052_s7 = smov 0  }
   0x4   :  { %s1054_s8 = smov 0   ;;  %s1056_s9 = smov 0  }
   0x5 LB: > { %s1071_s10 = sadd.s32 4294967295, %s1032_s9   ;;  %s866_s11 = sadd.s32 4294967294, %s1032_s9   ;;  %s1032_s9 = sphi %s1056_s9, %s1545_s9   ;;  %s1028_s8 = sphi %s1054_s8, %s1544_s8   ;;  %s1024_s7 = sphi %s1052_s7, %s1543_s7   ;;  %s1020_s6 = sphi %s1050_s6, %s1542_s6  }
   0x6   : > { %s1075_s12 = sadd.s32 1, %s1032_s9   ;;  %s24_s13 = sadd.s32 1, %s1028_s8 }
   0x7   : > { %s21_s14 = ssub.s32 %s1032_s9, %s1075_s12  ;;  %p31_p0 = scmp.ne.s32.totalorder %s1028_s8, %s1024_s7 }
   0x8   : > { %p22_p1 = scmp.eq.s32.totalorder %s21_s14, 0  ;;  %p32_p2 = scmp.eq.s32.totalorder %s1032_s9, 0 }
   0x9   : > { %p37_p3 = scmp.ne.s32.totalorder %s1024_s7, %s1020_s6  ;;  %p38_p4 = scmp.eq.s32.totalorder %s1071_s10, 0 }
   0xa   : > { %s1087_s15 = scalar_select %p22_p1, %s1028_s8, %s24_s13  }
   0xb   : > { %p1089_p5 = por %p32_p2, %p31_p0  ;;  %p1093_p6 = por %p38_p4, %p37_p3 }
   0xc   : > { %p61_p7 = scmp.eq.s32.totalorder %s1071_s10, 3  ;;  %p67_p8 = scmp.eq.s32.totalorder %s866_s11, 3 }
   0xd   : > { %p898_p9 = scmp.lt.s32.totalorder %s1032_s9, 4  ;;  %s87_s20 = sand.u32 1, %s1028_s8  }
   0xe   : > { %p1099_p10 = por %p61_p7, %p31_p0  ;;  %p1103_p11 = por %p67_p8, %p37_p3 }
   0xf   : > { %s883_s21 = sshll.u32 %s1032_s9, 14  ;;  %s869_s22 = sshll.u32 %s87_s20, 10 }
  0x10   : > { %s1537_s18 = scalar_select %p1099_p10, 1, 0 }
  0x11   : > { %s1538_s19 = scalar_select %p1103_p11, 1, 0 }
  0x12   : > { %s1112_s25 = scalar_lea.hbm %s1532_s0, %s883_s21  ;;  %s91_s26 = scalar_lea.vmem [#allocation2], %s869_s22 }
  0x13   : > { %s99_s27 = sshll.u32 %s91_s26, 4  ;;  %p1116_p12 = pnand %p898_p9, %p1089_p5  ;;  %s1120_s27 = int_to_ptr.vmem [resolvable:$true] %s99_s27 }
  0x14   : > { %s1122_s29 = scalar_lea.sflag [#allocation3], %s87_s20  ;;  %s936_s30 = scalar_lea.hbm %s1112_s25, 16384 }
  0x15   : > { %p937_p13 = scmp.ne.s32.totalorder %s1112_s25, %s936_s30  ;;  %p938_p0 = pneg %p1116_p12 }
  0x16   : > { %s941_s4 = scalar_lea.hbm %s1532_s0, 65536  ;;  %p942_p3 = scmp.lt.u32.totalorder %s1112_s25, %s1532_s0 }
  0x17   : > { %p939_p1 = pnand %p938_p0, %p937_p13  ;;  %p943_p4 = scmp.lt.u32.totalorder %s941_s4, %s936_s30 }
  0x18   : > { %p945_p7 = scmp.lt.u32.totalorder %s936_s30, %s1112_s25 }
  0x19   : > { %p940_p2 = pneg %p939_p1  ;;  %p944_p5 = por %p943_p4, %p942_p3 }
  0x1b   : > { %p946_p8 = por %p945_p7, %p944_p5 }
  0x1d   : > { %p947_p9 = pnand %p946_p8, %p940_p2 }
  0x1f   : > { %950 = shalt.err (!%p947_p9)
}
  0x20   : > { %s951_s13 = scalar_lea.vmem %s1120_s27, 16384  ;;  %s1034_s14 = smov [#allocation2]  }
  0x21   : > { %p952_p13 = scmp.ne.s32.totalorder %s1120_s27, %s951_s13  ;;  %s956_s16 = sshll.u32 %s1034_s14, 4  ;;  %s957_s16 = int_to_ptr.vmem [resolvable:$false] %s956_s16 }
  0x22   : > { %s958_s20 = scalar_lea.vmem %s957_s16, 32768  ;;  %p959_p10 = scmp.lt.s32.totalorder %s1120_s27, %s957_s16 }
  0x23   : > { %p954_p1 = pnand %p952_p13, %p938_p0  ;;  %p960_p3 = scmp.lt.s32.totalorder %s958_s20, %s951_s13 }
  0x25   : > { %p955_p11 = pneg %p954_p1  ;;  %p961_p4 = por %p960_p3, %p959_p10 }
  0x27   : > { %p962_p5 = pnand %p961_p4, %p955_p11 }
  0x29   : > { %965 = shalt.err (!%p962_p5)
}
  0x2a   : > { %s1035_s21 = smov 1024   ;;  %s1036_s22 = smov 64  }
  0x2b   : > { %893 = dma.hbm_to_vmem [thread:$0]  (!%p1116_p12), %s1112_s25, 16384, %s1120_s27, %s1122_s29, %s1035_s21, %s1035_s21, %s1036_s22  }
  0x2c   : > { %p873_p0 = scmp.ge.s32.totalorder %s1032_s9, 1  ;;  %p107_p2 = scmp.lt.s32.totalorder %s1032_s9, 5 }
  0x2e   : > { %p108_p7 = pnand %p873_p0, %p107_p2 }
  0x2f   : > { %s1153_s23 = sand.u32 (!%p108_p7), 1, %s1024_s7  }
  0x30   : > { %111 = sbr.rel (%p108_p7) target bundleno = 187 (0xbb), region = 24  ;;  %s874_s24 = sshll.u32 (!%p108_p7), %s1153_s23, 10 }
  0x31   : > { %s114_s26 = scalar_lea.sflag (!%p108_p7), [#allocation3], %s1153_s23  ;;  %s1157_s30 = scalar_lea.vmem (!%p108_p7), [#allocation2], %s874_s24 }
  0x37   : > { %1011 = dma.done.wait (%p1093_p6), %s114_s26, 16384  }
  0x38   : > { %1013 = vsyncadd (%p1093_p6), %s114_s26, 4294950912  ;;  %v138_v0 = vld [vmem:[%s1157_s30] sm:$0xff]  ;;  %v139_v1 = vld [vmem:[%s1157_s30 + $0x8] sm:$0xff]  ;;  %s1172_s17 = scalar_lea.vmem [#allocation5], %s874_s24  ;;  %s885_s25 = sshll.u32 %s1071_s10, 14 }
  0x39   : > { %v140_v2 = vld [vmem:[%s1157_s30 + $0x10] sm:$0xff]  ;;  %vm266_vm0 = vcmp.ge.f32.partialorder %v138_v0, 0.0  ;;  %v394_v3 = vmul.f32 0.15, %v138_v0  ;;  %vm267_vm1 = vcmp.ge.f32.partialorder %v139_v1, 0.0  ;;  %v141_v6 = vld [vmem:[%s1157_s30 + $0x18] sm:$0xff]  ;;  %s1483_s2 = scalar_lea.hbm %s1533_s1, %s885_s25 }
  0x3a   : > { %v395_v4 = vmul.f32 0.15, %v139_v1  ;;  %vm268_vm2 = vcmp.ge.f32.partialorder %v140_v2, 0.0  ;;  %v396_v5 = vmul.f32 0.15, %v140_v2  ;;  %v142_v7 = vld [vmem:[%s1157_s30 + $0x20] sm:$0xff] }
  0x3b   : > { %v143_v8 = vld [vmem:[%s1157_s30 + $0x28] sm:$0xff]  ;;  %v522_v9 = vsel %vm266_vm0, %v138_v0, %v394_v3  ;;  %vm269_vm3 = vcmp.ge.f32.partialorder %v141_v6, 0.0  ;;  %v397_v11 = vmul.f32 0.15, %v141_v6  ;;  %v144_v12 = vld [vmem:[%s1157_s30 + $0x30] sm:$0xff]  ;;  %v145_v13 = vld [vmem:[%s1157_s30 + $0x38] sm:$0xff] }
  0x3c   : > { %v523_v10 = vsel %vm267_vm1, %v139_v1, %v395_v4  ;;  %v146_v14 = vld [vmem:[%s1157_s30 + $0x40] sm:$0xff]  ;;  %650 = vst [vmem:[%s1172_s17] sm:$0xff] %v522_v9  ;;  %v524_v15 = vsel %vm268_vm2, %v140_v2, %v396_v5  ;;  %vm270_vm4 = vcmp.ge.f32.partialorder %v142_v7, 0.0  ;;  %v398_v16 = vmul.f32 0.15, %v142_v7  ;;  %v147_v17 = vld [vmem:[%s1157_s30 + $0x48] sm:$0xff]  ;;  %v148_v21 = vld [vmem:[%s1157_s30 + $0x50] sm:$0xff] }
  0x3d   : > { %651 = vst [vmem:[%s1172_s17 + $0x8] sm:$0xff] %v523_v10  ;;  %vm271_vm5 = vcmp.ge.f32.partialorder %v143_v8, 0.0  ;;  %652 = vst [vmem:[%s1172_s17 + $0x10] sm:$0xff] %v524_v15  ;;  %v525_v18 = vsel %vm269_vm3, %v141_v6, %v397_v11  ;;  %v399_v19 = vmul.f32 0.15, %v143_v8  ;;  %vm272_vm6 = vcmp.ge.f32.partialorder %v144_v12, 0.0 }
  0x3e   : > { %v400_v20 = vmul.f32 0.15, %v144_v12  ;;  %653 = vst [vmem:[%s1172_s17 + $0x18] sm:$0xff] %v525_v18  ;;  %v526_v22 = vsel %vm270_vm4, %v142_v7, %v398_v16  ;;  %vm273_vm7 = vcmp.ge.f32.partialorder %v145_v13, 0.0  ;;  %v401_v23 = vmul.f32 0.15, %v145_v13 }
  0x3f   : > { %vm274_vm8 = vcmp.ge.f32.partialorder %v146_v14, 0.0  ;;  %v149_v24 = vld [vmem:[%s1157_s30 + $0x58] sm:$0xff]  ;;  %v150_v25 = vld [vmem:[%s1157_s30 + $0x60] sm:$0xff]  ;;  %654 = vst [vmem:[%s1172_s17 + $0x20] sm:$0xff] %v526_v22  ;;  %v527_v26 = vsel %vm271_vm5, %v143_v8, %v399_v19  ;;  %v402_v28 = vmul.f32 0.15, %v146_v14 }
  0x40   : > { %v528_v27 = vsel %vm272_vm6, %v144_v12, %v400_v20  ;;  %vm275_vm9 = vcmp.ge.f32.partialorder %v147_v17, 0.0  ;;  %v151_v29 = vld [vmem:[%s1157_s30 + $0x68] sm:$0xff]  ;;  %655 = vst [vmem:[%s1172_s17 + $0x28] sm:$0xff] %v527_v26  ;;  %v529_v30 = vsel %vm273_vm7, %v145_v13, %v401_v23  ;;  %v403_v31 = vmul.f32 0.15, %v147_v17  ;;  %v152_v33 = vld [vmem:[%s1157_s30 + $0x70] sm:$0xff] }
  0x41   : > { %656 = vst [vmem:[%s1172_s17 + $0x30] sm:$0xff] %v528_v27  ;;  %vm276_vm10 = vcmp.ge.f32.partialorder %v148_v21, 0.0  ;;  %v404_v32 = vmul.f32 0.15, %v148_v21  ;;  %657 = vst [vmem:[%s1172_s17 + $0x38] sm:$0xff] %v529_v30  ;;  %v530_v34 = vsel %vm274_vm8, %v146_v14, %v402_v28  ;;  %vm277_vm11 = vcmp.ge.f32.partialorder %v149_v24, 0.0 }
  0x42   : > { %v405_v35 = vmul.f32 0.15, %v149_v24  ;;  %vm278_vm12 = vcmp.ge.f32.partialorder %v150_v25, 0.0  ;;  %v153_v36 = vld [vmem:[%s1157_s30 + $0x78] sm:$0xff]  ;;  %v154_v37 = vld [vmem:[%s1157_s30 + $0x80] sm:$0xff]  ;;  %658 = vst [vmem:[%s1172_s17 + $0x40] sm:$0xff] %v530_v34  ;;  %v531_v38 = vsel %vm275_vm9, %v147_v17, %v403_v31 }
  0x43   : > { %v532_v39 = vsel %vm276_vm10, %v148_v21, %v404_v32  ;;  %v406_v40 = vmul.f32 0.15, %v150_v25  ;;  %vm279_vm13 = vcmp.ge.f32.partialorder %v151_v29, 0.0  ;;  %v155_v41 = vld [vmem:[%s1157_s30 + $0x88] sm:$0xff]  ;;  %659 = vst [vmem:[%s1172_s17 + $0x48] sm:$0xff] %v531_v38  ;;  %vm280_vm14 = vcmp.ge.f32.partialorder %v152_v33, 0.0 }
  0x44   : > { %660 = vst [vmem:[%s1172_s17 + $0x50] sm:$0xff] %v532_v39  ;;  %v533_v42 = vsel %vm277_vm11, %v149_v24, %v405_v35  ;;  %v407_v43 = vmul.f32 0.15, %v151_v29  ;;  %v408_v44 = vmul.f32 0.15, %v152_v33  ;;  %v156_v45 = vld [vmem:[%s1157_s30 + $0x90] sm:$0xff] }
  0x45   : > { %661 = vst [vmem:[%s1172_s17 + $0x58] sm:$0xff] %v533_v42  ;;  %v534_v46 = vsel %vm278_vm12, %v150_v25, %v406_v40  ;;  %vm281_vm15 = vcmp.ge.f32.partialorder %v153_v36, 0.0  ;;  %v409_v47 = vmul.f32 0.15, %v153_v36  ;;  %vm282_vm0 = vcmp.ge.f32.partialorder %v154_v37, 0.0  ;;  %v157_v48 = vld [vmem:[%s1157_s30 + $0x98] sm:$0xff] }
  0x46   : > { %v158_v49 = vld [vmem:[%s1157_s30 + $0xa0] sm:$0xff]  ;;  %662 = vst [vmem:[%s1172_s17 + $0x60] sm:$0xff] %v534_v46  ;;  %v535_v50 = vsel %vm279_vm13, %v151_v29, %v407_v43  ;;  %v536_v51 = vsel %vm280_vm14, %v152_v33, %v408_v44  ;;  %v410_v52 = vmul.f32 0.15, %v154_v37  ;;  %vm283_vm1 = vcmp.ge.f32.partialorder %v155_v41, 0.0  ;;  %v159_v53 = vld [vmem:[%s1157_s30 + $0xa8] sm:$0xff] }
  0x47   : > { %663 = vst [vmem:[%s1172_s17 + $0x68] sm:$0xff] %v535_v50  ;;  %664 = vst [vmem:[%s1172_s17 + $0x70] sm:$0xff] %v536_v51  ;;  %v537_v54 = vsel %vm281_vm15, %v153_v36, %v409_v47  ;;  %v411_v55 = vmul.f32 0.15, %v155_v41  ;;  %vm284_vm2 = vcmp.ge.f32.partialorder %v156_v45, 0.0  ;;  %v160_v57 = vld [vmem:[%s1157_s30 + $0xb0] sm:$0xff] }
  0x48   : > { %v412_v56 = vmul.f32 0.15, %v156_v45  ;;  %665 = vst [vmem:[%s1172_s17 + $0x78] sm:$0xff] %v537_v54  ;;  %v538_v58 = vsel %vm282_vm0, %v154_v37, %v410_v52  ;;  %vm285_vm3 = vcmp.ge.f32.partialorder %v157_v48, 0.0  ;;  %v413_v59 = vmul.f32 0.15, %v157_v48 }
  0x49   : > { %vm286_vm4 = vcmp.ge.f32.partialorder %v158_v49, 0.0  ;;  %v161_v60 = vld [vmem:[%s1157_s30 + $0xb8] sm:$0xff]  ;;  %v162_v61 = vld [vmem:[%s1157_s30 + $0xc0] sm:$0xff]  ;;  %666 = vst [vmem:[%s1172_s17 + $0x80] sm:$0xff] %v538_v58  ;;  %v539_v62 = vsel %vm283_vm1, %v155_v41, %v411_v55  ;;  %v414_v0 = vmul.f32 0.15, %v158_v49 }
  0x4a   : > { %v540_v63 = vsel %vm284_vm2, %v156_v45, %v412_v56  ;;  %vm287_vm5 = vcmp.ge.f32.partialorder %v159_v53, 0.0  ;;  %v163_v1 = vld [vmem:[%s1157_s30 + $0xc8] sm:$0xff]  ;;  %667 = vst [vmem:[%s1172_s17 + $0x88] sm:$0xff] %v539_v62  ;;  %v541_v2 = vsel %vm285_vm3, %v157_v48, %v413_v59  ;;  %v415_v3 = vmul.f32 0.15, %v159_v53  ;;  %v164_v5 = vld [vmem:[%s1157_s30 + $0xd0] sm:$0xff] }
  0x4b   : > { %668 = vst [vmem:[%s1172_s17 + $0x90] sm:$0xff] %v540_v63  ;;  %vm288_vm6 = vcmp.ge.f32.partialorder %v160_v57, 0.0  ;;  %v416_v4 = vmul.f32 0.15, %v160_v57  ;;  %669 = vst [vmem:[%s1172_s17 + $0x98] sm:$0xff] %v541_v2  ;;  %v542_v6 = vsel %vm286_vm4, %v158_v49, %v414_v0  ;;  %vm289_vm7 = vcmp.ge.f32.partialorder %v161_v60, 0.0 }
  0x4c   : > { %v417_v7 = vmul.f32 0.15, %v161_v60  ;;  %vm290_vm8 = vcmp.ge.f32.partialorder %v162_v61, 0.0  ;;  %v165_v8 = vld [vmem:[%s1157_s30 + $0xd8] sm:$0xff]  ;;  %v166_v9 = vld [vmem:[%s1157_s30 + $0xe0] sm:$0xff]  ;;  %670 = vst [vmem:[%s1172_s17 + $0xa0] sm:$0xff] %v542_v6  ;;  %v543_v10 = vsel %vm287_vm5, %v159_v53, %v415_v3 }
  0x4d   : > { %v544_v11 = vsel %vm288_vm6, %v160_v57, %v416_v4  ;;  %v418_v12 = vmul.f32 0.15, %v162_v61  ;;  %vm291_vm9 = vcmp.ge.f32.partialorder %v163_v1, 0.0  ;;  %v167_v13 = vld [vmem:[%s1157_s30 + $0xe8] sm:$0xff]  ;;  %671 = vst [vmem:[%s1172_s17 + $0xa8] sm:$0xff] %v543_v10  ;;  %vm292_vm10 = vcmp.ge.f32.partialorder %v164_v5, 0.0 }
  0x4e   : > { %672 = vst [vmem:[%s1172_s17 + $0xb0] sm:$0xff] %v544_v11  ;;  %v545_v14 = vsel %vm289_vm7, %v161_v60, %v417_v7  ;;  %v419_v15 = vmul.f32 0.15, %v163_v1  ;;  %v420_v16 = vmul.f32 0.15, %v164_v5  ;;  %v168_v17 = vld [vmem:[%s1157_s30 + $0xf0] sm:$0xff] }
  0x4f   : > { %673 = vst [vmem:[%s1172_s17 + $0xb8] sm:$0xff] %v545_v14  ;;  %v546_v18 = vsel %vm290_vm8, %v162_v61, %v418_v12  ;;  %vm293_vm11 = vcmp.ge.f32.partialorder %v165_v8, 0.0  ;;  %v421_v19 = vmul.f32 0.15, %v165_v8  ;;  %vm294_vm12 = vcmp.ge.f32.partialorder %v166_v9, 0.0  ;;  %v169_v20 = vld [vmem:[%s1157_s30 + $0xf8] sm:$0xff] }
  0x50   : > { %v170_v21 = vld [vmem:[%s1157_s30 + $0x100] sm:$0xff]  ;;  %674 = vst [vmem:[%s1172_s17 + $0xc0] sm:$0xff] %v546_v18  ;;  %v547_v22 = vsel %vm291_vm9, %v163_v1, %v419_v15  ;;  %v548_v23 = vsel %vm292_vm10, %v164_v5, %v420_v16  ;;  %v422_v24 = vmul.f32 0.15, %v166_v9  ;;  %vm295_vm13 = vcmp.ge.f32.partialorder %v167_v13, 0.0  ;;  %v171_v25 = vld [vmem:[%s1157_s30 + $0x108] sm:$0xff] }
  0x51   : > { %675 = vst [vmem:[%s1172_s17 + $0xc8] sm:$0xff] %v547_v22  ;;  %676 = vst [vmem:[%s1172_s17 + $0xd0] sm:$0xff] %v548_v23  ;;  %v549_v26 = vsel %vm293_vm11, %v165_v8, %v421_v19  ;;  %v423_v27 = vmul.f32 0.15, %v167_v13  ;;  %vm296_vm14 = vcmp.ge.f32.partialorder %v168_v17, 0.0  ;;  %v172_v29 = vld [vmem:[%s1157_s30 + $0x110] sm:$0xff] }
  0x52   : > { %v424_v28 = vmul.f32 0.15, %v168_v17  ;;  %677 = vst [vmem:[%s1172_s17 + $0xd8] sm:$0xff] %v549_v26  ;;  %v550_v30 = vsel %vm294_vm12, %v166_v9, %v422_v24  ;;  %vm297_vm15 = vcmp.ge.f32.partialorder %v169_v20, 0.0  ;;  %v425_v31 = vmul.f32 0.15, %v169_v20 }
  0x53   : > { %vm298_vm0 = vcmp.ge.f32.partialorder %v170_v21, 0.0  ;;  %v173_v32 = vld [vmem:[%s1157_s30 + $0x118] sm:$0xff]  ;;  %v174_v33 = vld [vmem:[%s1157_s30 + $0x120] sm:$0xff]  ;;  %678 = vst [vmem:[%s1172_s17 + $0xe0] sm:$0xff] %v550_v30  ;;  %v551_v34 = vsel %vm295_vm13, %v167_v13, %v423_v27  ;;  %v426_v36 = vmul.f32 0.15, %v170_v21 }
  0x54   : > { %v552_v35 = vsel %vm296_vm14, %v168_v17, %v424_v28  ;;  %vm299_vm1 = vcmp.ge.f32.partialorder %v171_v25, 0.0  ;;  %v175_v37 = vld [vmem:[%s1157_s30 + $0x128] sm:$0xff]  ;;  %679 = vst [vmem:[%s1172_s17 + $0xe8] sm:$0xff] %v551_v34  ;;  %v553_v38 = vsel %vm297_vm15, %v169_v20, %v425_v31  ;;  %v427_v39 = vmul.f32 0.15, %v171_v25  ;;  %v176_v41 = vld [vmem:[%s1157_s30 + $0x130] sm:$0xff] }
  0x55   : > { %680 = vst [vmem:[%s1172_s17 + $0xf0] sm:$0xff] %v552_v35  ;;  %vm300_vm2 = vcmp.ge.f32.partialorder %v172_v29, 0.0  ;;  %v428_v40 = vmul.f32 0.15, %v172_v29  ;;  %681 = vst [vmem:[%s1172_s17 + $0xf8] sm:$0xff] %v553_v38  ;;  %v554_v42 = vsel %vm298_vm0, %v170_v21, %v426_v36  ;;  %vm301_vm3 = vcmp.ge.f32.partialorder %v173_v32, 0.0 }
  0x56   : > { %v429_v43 = vmul.f32 0.15, %v173_v32  ;;  %vm302_vm4 = vcmp.ge.f32.partialorder %v174_v33, 0.0  ;;  %v177_v44 = vld [vmem:[%s1157_s30 + $0x138] sm:$0xff]  ;;  %v178_v45 = vld [vmem:[%s1157_s30 + $0x140] sm:$0xff]  ;;  %682 = vst [vmem:[%s1172_s17 + $0x100] sm:$0xff] %v554_v42  ;;  %v555_v46 = vsel %vm299_vm1, %v171_v25, %v427_v39 }
  0x57   : > { %v556_v47 = vsel %vm300_vm2, %v172_v29, %v428_v40  ;;  %v430_v48 = vmul.f32 0.15, %v174_v33  ;;  %vm303_vm5 = vcmp.ge.f32.partialorder %v175_v37, 0.0  ;;  %v179_v49 = vld [vmem:[%s1157_s30 + $0x148] sm:$0xff]  ;;  %683 = vst [vmem:[%s1172_s17 + $0x108] sm:$0xff] %v555_v46  ;;  %vm304_vm6 = vcmp.ge.f32.partialorder %v176_v41, 0.0 }
  0x58   : > { %684 = vst [vmem:[%s1172_s17 + $0x110] sm:$0xff] %v556_v47  ;;  %v557_v50 = vsel %vm301_vm3, %v173_v32, %v429_v43  ;;  %v431_v51 = vmul.f32 0.15, %v175_v37  ;;  %v432_v52 = vmul.f32 0.15, %v176_v41  ;;  %v180_v53 = vld [vmem:[%s1157_s30 + $0x150] sm:$0xff] }
  0x59   : > { %685 = vst [vmem:[%s1172_s17 + $0x118] sm:$0xff] %v557_v50  ;;  %v558_v54 = vsel %vm302_vm4, %v174_v33, %v430_v48  ;;  %vm305_vm7 = vcmp.ge.f32.partialorder %v177_v44, 0.0  ;;  %v433_v55 = vmul.f32 0.15, %v177_v44  ;;  %vm306_vm8 = vcmp.ge.f32.partialorder %v178_v45, 0.0  ;;  %v181_v56 = vld [vmem:[%s1157_s30 + $0x158] sm:$0xff] }
  0x5a   : > { %v182_v57 = vld [vmem:[%s1157_s30 + $0x160] sm:$0xff]  ;;  %686 = vst [vmem:[%s1172_s17 + $0x120] sm:$0xff] %v558_v54  ;;  %v559_v58 = vsel %vm303_vm5, %v175_v37, %v431_v51  ;;  %v560_v59 = vsel %vm304_vm6, %v176_v41, %v432_v52  ;;  %v434_v60 = vmul.f32 0.15, %v178_v45  ;;  %vm307_vm9 = vcmp.ge.f32.partialorder %v179_v49, 0.0  ;;  %v183_v61 = vld [vmem:[%s1157_s30 + $0x168] sm:$0xff] }
  0x5b   : > { %687 = vst [vmem:[%s1172_s17 + $0x128] sm:$0xff] %v559_v58  ;;  %688 = vst [vmem:[%s1172_s17 + $0x130] sm:$0xff] %v560_v59  ;;  %v561_v62 = vsel %vm305_vm7, %v177_v44, %v433_v55  ;;  %v435_v63 = vmul.f32 0.15, %v179_v49  ;;  %vm308_vm10 = vcmp.ge.f32.partialorder %v180_v53, 0.0  ;;  %v184_v1 = vld [vmem:[%s1157_s30 + $0x170] sm:$0xff] }
  0x5c   : > { %v436_v0 = vmul.f32 0.15, %v180_v53  ;;  %689 = vst [vmem:[%s1172_s17 + $0x138] sm:$0xff] %v561_v62  ;;  %v562_v2 = vsel %vm306_vm8, %v178_v45, %v434_v60  ;;  %vm309_vm11 = vcmp.ge.f32.partialorder %v181_v56, 0.0  ;;  %v437_v3 = vmul.f32 0.15, %v181_v56 }
  0x5d   : > { %vm310_vm12 = vcmp.ge.f32.partialorder %v182_v57, 0.0  ;;  %v185_v4 = vld [vmem:[%s1157_s30 + $0x178] sm:$0xff]  ;;  %v186_v5 = vld [vmem:[%s1157_s30 + $0x180] sm:$0xff]  ;;  %690 = vst [vmem:[%s1172_s17 + $0x140] sm:$0xff] %v562_v2  ;;  %v563_v6 = vsel %vm307_vm9, %v179_v49, %v435_v63  ;;  %v438_v8 = vmul.f32 0.15, %v182_v57 }
  0x5e   : > { %v564_v7 = vsel %vm308_vm10, %v180_v53, %v436_v0  ;;  %vm311_vm13 = vcmp.ge.f32.partialorder %v183_v61, 0.0  ;;  %v187_v9 = vld [vmem:[%s1157_s30 + $0x188] sm:$0xff]  ;;  %691 = vst [vmem:[%s1172_s17 + $0x148] sm:$0xff] %v563_v6  ;;  %v565_v10 = vsel %vm309_vm11, %v181_v56, %v437_v3  ;;  %v439_v11 = vmul.f32 0.15, %v183_v61  ;;  %v188_v13 = vld [vmem:[%s1157_s30 + $0x190] sm:$0xff] }
  0x5f   : > { %692 = vst [vmem:[%s1172_s17 + $0x150] sm:$0xff] %v564_v7  ;;  %vm312_vm14 = vcmp.ge.f32.partialorder %v184_v1, 0.0  ;;  %v440_v12 = vmul.f32 0.15, %v184_v1  ;;  %693 = vst [vmem:[%s1172_s17 + $0x158] sm:$0xff] %v565_v10  ;;  %v566_v14 = vsel %vm310_vm12, %v182_v57, %v438_v8  ;;  %vm313_vm15 = vcmp.ge.f32.partialorder %v185_v4, 0.0 }
  0x60   : > { %v441_v15 = vmul.f32 0.15, %v185_v4  ;;  %vm314_vm0 = vcmp.ge.f32.partialorder %v186_v5, 0.0  ;;  %v189_v16 = vld [vmem:[%s1157_s30 + $0x198] sm:$0xff]  ;;  %v190_v17 = vld [vmem:[%s1157_s30 + $0x1a0] sm:$0xff]  ;;  %694 = vst [vmem:[%s1172_s17 + $0x160] sm:$0xff] %v566_v14  ;;  %v567_v18 = vsel %vm311_vm13, %v183_v61, %v439_v11 }
  0x61   : > { %v568_v19 = vsel %vm312_vm14, %v184_v1, %v440_v12  ;;  %v442_v20 = vmul.f32 0.15, %v186_v5  ;;  %vm315_vm1 = vcmp.ge.f32.partialorder %v187_v9, 0.0  ;;  %v191_v21 = vld [vmem:[%s1157_s30 + $0x1a8] sm:$0xff]  ;;  %695 = vst [vmem:[%s1172_s17 + $0x168] sm:$0xff] %v567_v18  ;;  %vm316_vm2 = vcmp.ge.f32.partialorder %v188_v13, 0.0 }
  0x62   : > { %696 = vst [vmem:[%s1172_s17 + $0x170] sm:$0xff] %v568_v19  ;;  %v569_v22 = vsel %vm313_vm15, %v185_v4, %v441_v15  ;;  %v443_v23 = vmul.f32 0.15, %v187_v9  ;;  %v444_v24 = vmul.f32 0.15, %v188_v13  ;;  %v192_v25 = vld [vmem:[%s1157_s30 + $0x1b0] sm:$0xff] }
  0x63   : > { %697 = vst [vmem:[%s1172_s17 + $0x178] sm:$0xff] %v569_v22  ;;  %v570_v26 = vsel %vm314_vm0, %v186_v5, %v442_v20  ;;  %vm317_vm3 = vcmp.ge.f32.partialorder %v189_v16, 0.0  ;;  %v445_v27 = vmul.f32 0.15, %v189_v16  ;;  %vm318_vm4 = vcmp.ge.f32.partialorder %v190_v17, 0.0  ;;  %v193_v28 = vld [vmem:[%s1157_s30 + $0x1b8] sm:$0xff] }
  0x64   : > { %v194_v29 = vld [vmem:[%s1157_s30 + $0x1c0] sm:$0xff]  ;;  %698 = vst [vmem:[%s1172_s17 + $0x180] sm:$0xff] %v570_v26  ;;  %v571_v30 = vsel %vm315_vm1, %v187_v9, %v443_v23  ;;  %v572_v31 = vsel %vm316_vm2, %v188_v13, %v444_v24  ;;  %v446_v32 = vmul.f32 0.15, %v190_v17  ;;  %vm319_vm5 = vcmp.ge.f32.partialorder %v191_v21, 0.0  ;;  %v195_v33 = vld [vmem:[%s1157_s30 + $0x1c8] sm:$0xff] }
  0x65   : > { %699 = vst [vmem:[%s1172_s17 + $0x188] sm:$0xff] %v571_v30  ;;  %700 = vst [vmem:[%s1172_s17 + $0x190] sm:$0xff] %v572_v31  ;;  %v573_v34 = vsel %vm317_vm3, %v189_v16, %v445_v27  ;;  %v447_v35 = vmul.f32 0.15, %v191_v21  ;;  %vm320_vm6 = vcmp.ge.f32.partialorder %v192_v25, 0.0  ;;  %v196_v37 = vld [vmem:[%s1157_s30 + $0x1d0] sm:$0xff] }
  0x66   : > { %v448_v36 = vmul.f32 0.15, %v192_v25  ;;  %701 = vst [vmem:[%s1172_s17 + $0x198] sm:$0xff] %v573_v34  ;;  %v574_v38 = vsel %vm318_vm4, %v190_v17, %v446_v32  ;;  %vm321_vm7 = vcmp.ge.f32.partialorder %v193_v28, 0.0  ;;  %v449_v39 = vmul.f32 0.15, %v193_v28 }
  0x67   : > { %vm322_vm8 = vcmp.ge.f32.partialorder %v194_v29, 0.0  ;;  %v197_v40 = vld [vmem:[%s1157_s30 + $0x1d8] sm:$0xff]  ;;  %v198_v41 = vld [vmem:[%s1157_s30 + $0x1e0] sm:$0xff]  ;;  %702 = vst [vmem:[%s1172_s17 + $0x1a0] sm:$0xff] %v574_v38  ;;  %v575_v42 = vsel %vm319_vm5, %v191_v21, %v447_v35  ;;  %v450_v44 = vmul.f32 0.15, %v194_v29 }
  0x68   : > { %v576_v43 = vsel %vm320_vm6, %v192_v25, %v448_v36  ;;  %vm323_vm9 = vcmp.ge.f32.partialorder %v195_v33, 0.0  ;;  %v199_v45 = vld [vmem:[%s1157_s30 + $0x1e8] sm:$0xff]  ;;  %703 = vst [vmem:[%s1172_s17 + $0x1a8] sm:$0xff] %v575_v42  ;;  %v577_v46 = vsel %vm321_vm7, %v193_v28, %v449_v39  ;;  %v451_v47 = vmul.f32 0.15, %v195_v33  ;;  %v200_v49 = vld [vmem:[%s1157_s30 + $0x1f0] sm:$0xff] }
  0x69   : > { %704 = vst [vmem:[%s1172_s17 + $0x1b0] sm:$0xff] %v576_v43  ;;  %vm324_vm10 = vcmp.ge.f32.partialorder %v196_v37, 0.0  ;;  %v452_v48 = vmul.f32 0.15, %v196_v37  ;;  %705 = vst [vmem:[%s1172_s17 + $0x1b8] sm:$0xff] %v577_v46  ;;  %v578_v50 = vsel %vm322_vm8, %v194_v29, %v450_v44  ;;  %vm325_vm11 = vcmp.ge.f32.partialorder %v197_v40, 0.0 }
  0x6a   : > { %v453_v51 = vmul.f32 0.15, %v197_v40  ;;  %vm326_vm12 = vcmp.ge.f32.partialorder %v198_v41, 0.0  ;;  %v201_v52 = vld [vmem:[%s1157_s30 + $0x1f8] sm:$0xff]  ;;  %v202_v53 = vld [vmem:[%s1157_s30 + $0x200] sm:$0xff]  ;;  %706 = vst [vmem:[%s1172_s17 + $0x1c0] sm:$0xff] %v578_v50  ;;  %v579_v54 = vsel %vm323_vm9, %v195_v33, %v451_v47 }
  0x6b   : > { %v580_v55 = vsel %vm324_vm10, %v196_v37, %v452_v48  ;;  %v454_v56 = vmul.f32 0.15, %v198_v41  ;;  %vm327_vm13 = vcmp.ge.f32.partialorder %v199_v45, 0.0  ;;  %v203_v57 = vld [vmem:[%s1157_s30 + $0x208] sm:$0xff]  ;;  %707 = vst [vmem:[%s1172_s17 + $0x1c8] sm:$0xff] %v579_v54  ;;  %vm328_vm14 = vcmp.ge.f32.partialorder %v200_v49, 0.0 }
  0x6c   : > { %708 = vst [vmem:[%s1172_s17 + $0x1d0] sm:$0xff] %v580_v55  ;;  %v581_v58 = vsel %vm325_vm11, %v197_v40, %v453_v51  ;;  %v455_v59 = vmul.f32 0.15, %v199_v45  ;;  %v456_v60 = vmul.f32 0.15, %v200_v49  ;;  %v204_v61 = vld [vmem:[%s1157_s30 + $0x210] sm:$0xff] }
  0x6d   : > { %709 = vst [vmem:[%s1172_s17 + $0x1d8] sm:$0xff] %v581_v58  ;;  %v582_v62 = vsel %vm326_vm12, %v198_v41, %v454_v56  ;;  %vm329_vm15 = vcmp.ge.f32.partialorder %v201_v52, 0.0  ;;  %v457_v63 = vmul.f32 0.15, %v201_v52  ;;  %vm330_vm0 = vcmp.ge.f32.partialorder %v202_v53, 0.0  ;;  %v205_v0 = vld [vmem:[%s1157_s30 + $0x218] sm:$0xff] }
  0x6e   : > { %v206_v1 = vld [vmem:[%s1157_s30 + $0x220] sm:$0xff]  ;;  %710 = vst [vmem:[%s1172_s17 + $0x1e0] sm:$0xff] %v582_v62  ;;  %v583_v2 = vsel %vm327_vm13, %v199_v45, %v455_v59  ;;  %v584_v3 = vsel %vm328_vm14, %v200_v49, %v456_v60  ;;  %v458_v4 = vmul.f32 0.15, %v202_v53  ;;  %vm331_vm1 = vcmp.ge.f32.partialorder %v203_v57, 0.0  ;;  %v207_v5 = vld [vmem:[%s1157_s30 + $0x228] sm:$0xff] }
  0x6f   : > { %711 = vst [vmem:[%s1172_s17 + $0x1e8] sm:$0xff] %v583_v2  ;;  %712 = vst [vmem:[%s1172_s17 + $0x1f0] sm:$0xff] %v584_v3  ;;  %v585_v6 = vsel %vm329_vm15, %v201_v52, %v457_v63  ;;  %v459_v7 = vmul.f32 0.15, %v203_v57  ;;  %vm332_vm2 = vcmp.ge.f32.partialorder %v204_v61, 0.0  ;;  %v208_v9 = vld [vmem:[%s1157_s30 + $0x230] sm:$0xff] }
  0x70   : > { %v460_v8 = vmul.f32 0.15, %v204_v61  ;;  %713 = vst [vmem:[%s1172_s17 + $0x1f8] sm:$0xff] %v585_v6  ;;  %v586_v10 = vsel %vm330_vm0, %v202_v53, %v458_v4  ;;  %vm333_vm3 = vcmp.ge.f32.partialorder %v205_v0, 0.0  ;;  %v461_v11 = vmul.f32 0.15, %v205_v0 }
  0x71   : > { %vm334_vm4 = vcmp.ge.f32.partialorder %v206_v1, 0.0  ;;  %v209_v12 = vld [vmem:[%s1157_s30 + $0x238] sm:$0xff]  ;;  %v210_v13 = vld [vmem:[%s1157_s30 + $0x240] sm:$0xff]  ;;  %714 = vst [vmem:[%s1172_s17 + $0x200] sm:$0xff] %v586_v10  ;;  %v587_v14 = vsel %vm331_vm1, %v203_v57, %v459_v7  ;;  %v462_v16 = vmul.f32 0.15, %v206_v1 }
  0x72   : > { %v588_v15 = vsel %vm332_vm2, %v204_v61, %v460_v8  ;;  %vm335_vm5 = vcmp.ge.f32.partialorder %v207_v5, 0.0  ;;  %v211_v17 = vld [vmem:[%s1157_s30 + $0x248] sm:$0xff]  ;;  %715 = vst [vmem:[%s1172_s17 + $0x208] sm:$0xff] %v587_v14  ;;  %v589_v18 = vsel %vm333_vm3, %v205_v0, %v461_v11  ;;  %v463_v19 = vmul.f32 0.15, %v207_v5  ;;  %v212_v21 = vld [vmem:[%s1157_s30 + $0x250] sm:$0xff] }
  0x73   : > { %716 = vst [vmem:[%s1172_s17 + $0x210] sm:$0xff] %v588_v15  ;;  %vm336_vm6 = vcmp.ge.f32.partialorder %v208_v9, 0.0  ;;  %v464_v20 = vmul.f32 0.15, %v208_v9  ;;  %717 = vst [vmem:[%s1172_s17 + $0x218] sm:$0xff] %v589_v18  ;;  %v590_v22 = vsel %vm334_vm4, %v206_v1, %v462_v16  ;;  %vm337_vm7 = vcmp.ge.f32.partialorder %v209_v12, 0.0 }
  0x74   : > { %v465_v23 = vmul.f32 0.15, %v209_v12  ;;  %vm338_vm8 = vcmp.ge.f32.partialorder %v210_v13, 0.0  ;;  %v213_v24 = vld [vmem:[%s1157_s30 + $0x258] sm:$0xff]  ;;  %v214_v25 = vld [vmem:[%s1157_s30 + $0x260] sm:$0xff]  ;;  %718 = vst [vmem:[%s1172_s17 + $0x220] sm:$0xff] %v590_v22  ;;  %v591_v26 = vsel %vm335_vm5, %v207_v5, %v463_v19 }
  0x75   : > { %v592_v27 = vsel %vm336_vm6, %v208_v9, %v464_v20  ;;  %v466_v28 = vmul.f32 0.15, %v210_v13  ;;  %vm339_vm9 = vcmp.ge.f32.partialorder %v211_v17, 0.0  ;;  %v215_v29 = vld [vmem:[%s1157_s30 + $0x268] sm:$0xff]  ;;  %719 = vst [vmem:[%s1172_s17 + $0x228] sm:$0xff] %v591_v26  ;;  %vm340_vm10 = vcmp.ge.f32.partialorder %v212_v21, 0.0 }
  0x76   : > { %720 = vst [vmem:[%s1172_s17 + $0x230] sm:$0xff] %v592_v27  ;;  %v593_v30 = vsel %vm337_vm7, %v209_v12, %v465_v23  ;;  %v467_v31 = vmul.f32 0.15, %v211_v17  ;;  %v468_v32 = vmul.f32 0.15, %v212_v21  ;;  %v216_v33 = vld [vmem:[%s1157_s30 + $0x270] sm:$0xff] }
  0x77   : > { %721 = vst [vmem:[%s1172_s17 + $0x238] sm:$0xff] %v593_v30  ;;  %v594_v34 = vsel %vm338_vm8, %v210_v13, %v466_v28  ;;  %vm341_vm11 = vcmp.ge.f32.partialorder %v213_v24, 0.0  ;;  %v469_v35 = vmul.f32 0.15, %v213_v24  ;;  %vm342_vm12 = vcmp.ge.f32.partialorder %v214_v25, 0.0  ;;  %v217_v36 = vld [vmem:[%s1157_s30 + $0x278] sm:$0xff] }
  0x78   : > { %v218_v37 = vld [vmem:[%s1157_s30 + $0x280] sm:$0xff]  ;;  %722 = vst [vmem:[%s1172_s17 + $0x240] sm:$0xff] %v594_v34  ;;  %v595_v38 = vsel %vm339_vm9, %v211_v17, %v467_v31  ;;  %v596_v39 = vsel %vm340_vm10, %v212_v21, %v468_v32  ;;  %v470_v40 = vmul.f32 0.15, %v214_v25  ;;  %vm343_vm13 = vcmp.ge.f32.partialorder %v215_v29, 0.0  ;;  %v219_v41 = vld [vmem:[%s1157_s30 + $0x288] sm:$0xff] }
  0x79   : > { %723 = vst [vmem:[%s1172_s17 + $0x248] sm:$0xff] %v595_v38  ;;  %724 = vst [vmem:[%s1172_s17 + $0x250] sm:$0xff] %v596_v39  ;;  %v597_v42 = vsel %vm341_vm11, %v213_v24, %v469_v35  ;;  %v471_v43 = vmul.f32 0.15, %v215_v29  ;;  %vm344_vm14 = vcmp.ge.f32.partialorder %v216_v33, 0.0  ;;  %v220_v45 = vld [vmem:[%s1157_s30 + $0x290] sm:$0xff] }
  0x7a   : > { %v472_v44 = vmul.f32 0.15, %v216_v33  ;;  %725 = vst [vmem:[%s1172_s17 + $0x258] sm:$0xff] %v597_v42  ;;  %v598_v46 = vsel %vm342_vm12, %v214_v25, %v470_v40  ;;  %vm345_vm15 = vcmp.ge.f32.partialorder %v217_v36, 0.0  ;;  %v473_v47 = vmul.f32 0.15, %v217_v36 }
  0x7b   : > { %vm346_vm0 = vcmp.ge.f32.partialorder %v218_v37, 0.0  ;;  %v221_v48 = vld [vmem:[%s1157_s30 + $0x298] sm:$0xff]  ;;  %v222_v49 = vld [vmem:[%s1157_s30 + $0x2a0] sm:$0xff]  ;;  %726 = vst [vmem:[%s1172_s17 + $0x260] sm:$0xff] %v598_v46  ;;  %v599_v50 = vsel %vm343_vm13, %v215_v29, %v471_v43  ;;  %v474_v52 = vmul.f32 0.15, %v218_v37 }
  0x7c   : > { %v600_v51 = vsel %vm344_vm14, %v216_v33, %v472_v44  ;;  %vm347_vm1 = vcmp.ge.f32.partialorder %v219_v41, 0.0  ;;  %v223_v53 = vld [vmem:[%s1157_s30 + $0x2a8] sm:$0xff]  ;;  %727 = vst [vmem:[%s1172_s17 + $0x268] sm:$0xff] %v599_v50  ;;  %v601_v54 = vsel %vm345_vm15, %v217_v36, %v473_v47  ;;  %v475_v55 = vmul.f32 0.15, %v219_v41  ;;  %v224_v57 = vld [vmem:[%s1157_s30 + $0x2b0] sm:$0xff] }
  0x7d   : > { %728 = vst [vmem:[%s1172_s17 + $0x270] sm:$0xff] %v600_v51  ;;  %vm348_vm2 = vcmp.ge.f32.partialorder %v220_v45, 0.0  ;;  %v476_v56 = vmul.f32 0.15, %v220_v45  ;;  %729 = vst [vmem:[%s1172_s17 + $0x278] sm:$0xff] %v601_v54  ;;  %v602_v58 = vsel %vm346_vm0, %v218_v37, %v474_v52  ;;  %vm349_vm3 = vcmp.ge.f32.partialorder %v221_v48, 0.0 }
  0x7e   : > { %v477_v59 = vmul.f32 0.15, %v221_v48  ;;  %vm350_vm4 = vcmp.ge.f32.partialorder %v222_v49, 0.0  ;;  %v225_v60 = vld [vmem:[%s1157_s30 + $0x2b8] sm:$0xff]  ;;  %v226_v61 = vld [vmem:[%s1157_s30 + $0x2c0] sm:$0xff]  ;;  %730 = vst [vmem:[%s1172_s17 + $0x280] sm:$0xff] %v602_v58  ;;  %v603_v62 = vsel %vm347_vm1, %v219_v41, %v475_v55 }
  0x7f   : > { %v604_v63 = vsel %vm348_vm2, %v220_v45, %v476_v56  ;;  %v478_v0 = vmul.f32 0.15, %v222_v49  ;;  %vm351_vm5 = vcmp.ge.f32.partialorder %v223_v53, 0.0  ;;  %v227_v1 = vld [vmem:[%s1157_s30 + $0x2c8] sm:$0xff]  ;;  %731 = vst [vmem:[%s1172_s17 + $0x288] sm:$0xff] %v603_v62  ;;  %vm352_vm6 = vcmp.ge.f32.partialorder %v224_v57, 0.0 }
  0x80   : > { %732 = vst [vmem:[%s1172_s17 + $0x290] sm:$0xff] %v604_v63  ;;  %v605_v2 = vsel %vm349_vm3, %v221_v48, %v477_v59  ;;  %v479_v3 = vmul.f32 0.15, %v223_v53  ;;  %v480_v4 = vmul.f32 0.15, %v224_v57  ;;  %v228_v5 = vld [vmem:[%s1157_s30 + $0x2d0] sm:$0xff] }
  0x81   : > { %733 = vst [vmem:[%s1172_s17 + $0x298] sm:$0xff] %v605_v2  ;;  %v606_v6 = vsel %vm350_vm4, %v222_v49, %v478_v0  ;;  %vm353_vm7 = vcmp.ge.f32.partialorder %v225_v60, 0.0  ;;  %v481_v7 = vmul.f32 0.15, %v225_v60  ;;  %vm354_vm8 = vcmp.ge.f32.partialorder %v226_v61, 0.0  ;;  %v229_v8 = vld [vmem:[%s1157_s30 + $0x2d8] sm:$0xff] }
  0x82   : > { %v230_v9 = vld [vmem:[%s1157_s30 + $0x2e0] sm:$0xff]  ;;  %734 = vst [vmem:[%s1172_s17 + $0x2a0] sm:$0xff] %v606_v6  ;;  %v607_v10 = vsel %vm351_vm5, %v223_v53, %v479_v3  ;;  %v608_v11 = vsel %vm352_vm6, %v224_v57, %v480_v4  ;;  %v482_v12 = vmul.f32 0.15, %v226_v61  ;;  %vm355_vm9 = vcmp.ge.f32.partialorder %v227_v1, 0.0  ;;  %v231_v13 = vld [vmem:[%s1157_s30 + $0x2e8] sm:$0xff] }
  0x83   : > { %735 = vst [vmem:[%s1172_s17 + $0x2a8] sm:$0xff] %v607_v10  ;;  %736 = vst [vmem:[%s1172_s17 + $0x2b0] sm:$0xff] %v608_v11  ;;  %v609_v14 = vsel %vm353_vm7, %v225_v60, %v481_v7  ;;  %v483_v15 = vmul.f32 0.15, %v227_v1  ;;  %vm356_vm10 = vcmp.ge.f32.partialorder %v228_v5, 0.0  ;;  %v232_v17 = vld [vmem:[%s1157_s30 + $0x2f0] sm:$0xff] }
  0x84   : > { %v484_v16 = vmul.f32 0.15, %v228_v5  ;;  %737 = vst [vmem:[%s1172_s17 + $0x2b8] sm:$0xff] %v609_v14  ;;  %v610_v18 = vsel %vm354_vm8, %v226_v61, %v482_v12  ;;  %vm357_vm11 = vcmp.ge.f32.partialorder %v229_v8, 0.0  ;;  %v485_v19 = vmul.f32 0.15, %v229_v8 }
  0x85   : > { %vm358_vm12 = vcmp.ge.f32.partialorder %v230_v9, 0.0  ;;  %v233_v20 = vld [vmem:[%s1157_s30 + $0x2f8] sm:$0xff]  ;;  %v234_v21 = vld [vmem:[%s1157_s30 + $0x300] sm:$0xff]  ;;  %738 = vst [vmem:[%s1172_s17 + $0x2c0] sm:$0xff] %v610_v18  ;;  %v611_v22 = vsel %vm355_vm9, %v227_v1, %v483_v15  ;;  %v486_v24 = vmul.f32 0.15, %v230_v9 }
  0x86   : > { %v612_v23 = vsel %vm356_vm10, %v228_v5, %v484_v16  ;;  %vm359_vm13 = vcmp.ge.f32.partialorder %v231_v13, 0.0  ;;  %v235_v25 = vld [vmem:[%s1157_s30 + $0x308] sm:$0xff]  ;;  %739 = vst [vmem:[%s1172_s17 + $0x2c8] sm:$0xff] %v611_v22  ;;  %v613_v26 = vsel %vm357_vm11, %v229_v8, %v485_v19  ;;  %v487_v27 = vmul.f32 0.15, %v231_v13  ;;  %v236_v29 = vld [vmem:[%s1157_s30 + $0x310] sm:$0xff] }
  0x87   : > { %740 = vst [vmem:[%s1172_s17 + $0x2d0] sm:$0xff] %v612_v23  ;;  %vm360_vm14 = vcmp.ge.f32.partialorder %v232_v17, 0.0  ;;  %v488_v28 = vmul.f32 0.15, %v232_v17  ;;  %741 = vst [vmem:[%s1172_s17 + $0x2d8] sm:$0xff] %v613_v26  ;;  %v614_v30 = vsel %vm358_vm12, %v230_v9, %v486_v24  ;;  %vm361_vm15 = vcmp.ge.f32.partialorder %v233_v20, 0.0 }
  0x88   : > { %v489_v31 = vmul.f32 0.15, %v233_v20  ;;  %vm362_vm0 = vcmp.ge.f32.partialorder %v234_v21, 0.0  ;;  %v237_v32 = vld [vmem:[%s1157_s30 + $0x318] sm:$0xff]  ;;  %v238_v33 = vld [vmem:[%s1157_s30 + $0x320] sm:$0xff]  ;;  %742 = vst [vmem:[%s1172_s17 + $0x2e0] sm:$0xff] %v614_v30  ;;  %v615_v34 = vsel %vm359_vm13, %v231_v13, %v487_v27 }
  0x89   : > { %v616_v35 = vsel %vm360_vm14, %v232_v17, %v488_v28  ;;  %v490_v36 = vmul.f32 0.15, %v234_v21  ;;  %vm363_vm1 = vcmp.ge.f32.partialorder %v235_v25, 0.0  ;;  %v239_v37 = vld [vmem:[%s1157_s30 + $0x328] sm:$0xff]  ;;  %743 = vst [vmem:[%s1172_s17 + $0x2e8] sm:$0xff] %v615_v34  ;;  %vm364_vm2 = vcmp.ge.f32.partialorder %v236_v29, 0.0 }
  0x8a   : > { %744 = vst [vmem:[%s1172_s17 + $0x2f0] sm:$0xff] %v616_v35  ;;  %v617_v38 = vsel %vm361_vm15, %v233_v20, %v489_v31  ;;  %v491_v39 = vmul.f32 0.15, %v235_v25  ;;  %v492_v40 = vmul.f32 0.15, %v236_v29  ;;  %v240_v41 = vld [vmem:[%s1157_s30 + $0x330] sm:$0xff] }
  0x8b   : > { %745 = vst [vmem:[%s1172_s17 + $0x2f8] sm:$0xff] %v617_v38  ;;  %v618_v42 = vsel %vm362_vm0, %v234_v21, %v490_v36  ;;  %vm365_vm3 = vcmp.ge.f32.partialorder %v237_v32, 0.0  ;;  %v493_v43 = vmul.f32 0.15, %v237_v32  ;;  %vm366_vm4 = vcmp.ge.f32.partialorder %v238_v33, 0.0  ;;  %v241_v44 = vld [vmem:[%s1157_s30 + $0x338] sm:$0xff] }
  0x8c   : > { %v242_v45 = vld [vmem:[%s1157_s30 + $0x340] sm:$0xff]  ;;  %746 = vst [vmem:[%s1172_s17 + $0x300] sm:$0xff] %v618_v42  ;;  %v619_v46 = vsel %vm363_vm1, %v235_v25, %v491_v39  ;;  %v620_v47 = vsel %vm364_vm2, %v236_v29, %v492_v40  ;;  %v494_v48 = vmul.f32 0.15, %v238_v33  ;;  %vm367_vm5 = vcmp.ge.f32.partialorder %v239_v37, 0.0  ;;  %v243_v49 = vld [vmem:[%s1157_s30 + $0x348] sm:$0xff] }
  0x8d   : > { %747 = vst [vmem:[%s1172_s17 + $0x308] sm:$0xff] %v619_v46  ;;  %748 = vst [vmem:[%s1172_s17 + $0x310] sm:$0xff] %v620_v47  ;;  %v621_v50 = vsel %vm365_vm3, %v237_v32, %v493_v43  ;;  %v495_v51 = vmul.f32 0.15, %v239_v37  ;;  %vm368_vm6 = vcmp.ge.f32.partialorder %v240_v41, 0.0  ;;  %v244_v53 = vld [vmem:[%s1157_s30 + $0x350] sm:$0xff] }
  0x8e   : > { %v496_v52 = vmul.f32 0.15, %v240_v41  ;;  %749 = vst [vmem:[%s1172_s17 + $0x318] sm:$0xff] %v621_v50  ;;  %v622_v54 = vsel %vm366_vm4, %v238_v33, %v494_v48  ;;  %vm369_vm7 = vcmp.ge.f32.partialorder %v241_v44, 0.0  ;;  %v497_v55 = vmul.f32 0.15, %v241_v44 }
  0x8f   : > { %vm370_vm8 = vcmp.ge.f32.partialorder %v242_v45, 0.0  ;;  %v245_v56 = vld [vmem:[%s1157_s30 + $0x358] sm:$0xff]  ;;  %v246_v57 = vld [vmem:[%s1157_s30 + $0x360] sm:$0xff]  ;;  %750 = vst [vmem:[%s1172_s17 + $0x320] sm:$0xff] %v622_v54  ;;  %v623_v58 = vsel %vm367_vm5, %v239_v37, %v495_v51  ;;  %v498_v60 = vmul.f32 0.15, %v242_v45 }
  0x90   : > { %v624_v59 = vsel %vm368_vm6, %v240_v41, %v496_v52  ;;  %vm371_vm9 = vcmp.ge.f32.partialorder %v243_v49, 0.0  ;;  %v247_v61 = vld [vmem:[%s1157_s30 + $0x368] sm:$0xff]  ;;  %751 = vst [vmem:[%s1172_s17 + $0x328] sm:$0xff] %v623_v58  ;;  %v625_v62 = vsel %vm369_vm7, %v241_v44, %v497_v55  ;;  %v499_v63 = vmul.f32 0.15, %v243_v49  ;;  %v248_v1 = vld [vmem:[%s1157_s30 + $0x370] sm:$0xff] }
  0x91   : > { %752 = vst [vmem:[%s1172_s17 + $0x330] sm:$0xff] %v624_v59  ;;  %vm372_vm10 = vcmp.ge.f32.partialorder %v244_v53, 0.0  ;;  %v500_v0 = vmul.f32 0.15, %v244_v53  ;;  %753 = vst [vmem:[%s1172_s17 + $0x338] sm:$0xff] %v625_v62  ;;  %v626_v2 = vsel %vm370_vm8, %v242_v45, %v498_v60  ;;  %vm373_vm11 = vcmp.ge.f32.partialorder %v245_v56, 0.0 }
  0x92   : > { %v501_v3 = vmul.f32 0.15, %v245_v56  ;;  %vm374_vm12 = vcmp.ge.f32.partialorder %v246_v57, 0.0  ;;  %v249_v4 = vld [vmem:[%s1157_s30 + $0x378] sm:$0xff]  ;;  %v250_v5 = vld [vmem:[%s1157_s30 + $0x380] sm:$0xff]  ;;  %754 = vst [vmem:[%s1172_s17 + $0x340] sm:$0xff] %v626_v2  ;;  %v627_v6 = vsel %vm371_vm9, %v243_v49, %v499_v63 }
  0x93   : > { %v628_v7 = vsel %vm372_vm10, %v244_v53, %v500_v0  ;;  %v502_v8 = vmul.f32 0.15, %v246_v57  ;;  %vm375_vm13 = vcmp.ge.f32.partialorder %v247_v61, 0.0  ;;  %v251_v9 = vld [vmem:[%s1157_s30 + $0x388] sm:$0xff]  ;;  %755 = vst [vmem:[%s1172_s17 + $0x348] sm:$0xff] %v627_v6  ;;  %vm376_vm14 = vcmp.ge.f32.partialorder %v248_v1, 0.0 }
  0x94   : > { %756 = vst [vmem:[%s1172_s17 + $0x350] sm:$0xff] %v628_v7  ;;  %v629_v10 = vsel %vm373_vm11, %v245_v56, %v501_v3  ;;  %v503_v11 = vmul.f32 0.15, %v247_v61  ;;  %v504_v12 = vmul.f32 0.15, %v248_v1  ;;  %v252_v13 = vld [vmem:[%s1157_s30 + $0x390] sm:$0xff] }
  0x95   : > { %757 = vst [vmem:[%s1172_s17 + $0x358] sm:$0xff] %v629_v10  ;;  %v630_v14 = vsel %vm374_vm12, %v246_v57, %v502_v8  ;;  %vm377_vm15 = vcmp.ge.f32.partialorder %v249_v4, 0.0  ;;  %v505_v15 = vmul.f32 0.15, %v249_v4  ;;  %vm378_vm0 = vcmp.ge.f32.partialorder %v250_v5, 0.0  ;;  %v253_v16 = vld [vmem:[%s1157_s30 + $0x398] sm:$0xff] }
  0x96   : > { %v254_v17 = vld [vmem:[%s1157_s30 + $0x3a0] sm:$0xff]  ;;  %758 = vst [vmem:[%s1172_s17 + $0x360] sm:$0xff] %v630_v14  ;;  %v631_v18 = vsel %vm375_vm13, %v247_v61, %v503_v11  ;;  %v632_v19 = vsel %vm376_vm14, %v248_v1, %v504_v12  ;;  %v506_v20 = vmul.f32 0.15, %v250_v5  ;;  %vm379_vm1 = vcmp.ge.f32.partialorder %v251_v9, 0.0  ;;  %v255_v21 = vld [vmem:[%s1157_s30 + $0x3a8] sm:$0xff] }
  0x97   : > { %759 = vst [vmem:[%s1172_s17 + $0x368] sm:$0xff] %v631_v18  ;;  %760 = vst [vmem:[%s1172_s17 + $0x370] sm:$0xff] %v632_v19  ;;  %v633_v22 = vsel %vm377_vm15, %v249_v4, %v505_v15  ;;  %v507_v23 = vmul.f32 0.15, %v251_v9  ;;  %vm380_vm2 = vcmp.ge.f32.partialorder %v252_v13, 0.0  ;;  %v256_v25 = vld [vmem:[%s1157_s30 + $0x3b0] sm:$0xff] }
  0x98   : > { %v508_v24 = vmul.f32 0.15, %v252_v13  ;;  %761 = vst [vmem:[%s1172_s17 + $0x378] sm:$0xff] %v633_v22  ;;  %v634_v26 = vsel %vm378_vm0, %v250_v5, %v506_v20  ;;  %vm381_vm3 = vcmp.ge.f32.partialorder %v253_v16, 0.0  ;;  %v509_v27 = vmul.f32 0.15, %v253_v16 }
  0x99   : > { %vm382_vm4 = vcmp.ge.f32.partialorder %v254_v17, 0.0  ;;  %v257_v28 = vld [vmem:[%s1157_s30 + $0x3b8] sm:$0xff]  ;;  %v258_v29 = vld [vmem:[%s1157_s30 + $0x3c0] sm:$0xff]  ;;  %762 = vst [vmem:[%s1172_s17 + $0x380] sm:$0xff] %v634_v26  ;;  %v635_v30 = vsel %vm379_vm1, %v251_v9, %v507_v23  ;;  %v510_v32 = vmul.f32 0.15, %v254_v17 }
  0x9a   : > { %v636_v31 = vsel %vm380_vm2, %v252_v13, %v508_v24  ;;  %vm383_vm5 = vcmp.ge.f32.partialorder %v255_v21, 0.0  ;;  %v259_v33 = vld [vmem:[%s1157_s30 + $0x3c8] sm:$0xff]  ;;  %763 = vst [vmem:[%s1172_s17 + $0x388] sm:$0xff] %v635_v30  ;;  %v637_v34 = vsel %vm381_vm3, %v253_v16, %v509_v27  ;;  %v511_v35 = vmul.f32 0.15, %v255_v21  ;;  %v260_v37 = vld [vmem:[%s1157_s30 + $0x3d0] sm:$0xff] }
  0x9b   : > { %764 = vst [vmem:[%s1172_s17 + $0x390] sm:$0xff] %v636_v31  ;;  %vm384_vm6 = vcmp.ge.f32.partialorder %v256_v25, 0.0  ;;  %v512_v36 = vmul.f32 0.15, %v256_v25  ;;  %765 = vst [vmem:[%s1172_s17 + $0x398] sm:$0xff] %v637_v34  ;;  %v638_v38 = vsel %vm382_vm4, %v254_v17, %v510_v32  ;;  %vm385_vm7 = vcmp.ge.f32.partialorder %v257_v28, 0.0 }
  0x9c   : > { %v513_v39 = vmul.f32 0.15, %v257_v28  ;;  %vm386_vm8 = vcmp.ge.f32.partialorder %v258_v29, 0.0  ;;  %v261_v40 = vld [vmem:[%s1157_s30 + $0x3d8] sm:$0xff]  ;;  %v262_v41 = vld [vmem:[%s1157_s30 + $0x3e0] sm:$0xff]  ;;  %766 = vst [vmem:[%s1172_s17 + $0x3a0] sm:$0xff] %v638_v38  ;;  %v639_v42 = vsel %vm383_vm5, %v255_v21, %v511_v35 }
  0x9d   : > { %v640_v43 = vsel %vm384_vm6, %v256_v25, %v512_v36  ;;  %v514_v44 = vmul.f32 0.15, %v258_v29  ;;  %vm387_vm9 = vcmp.ge.f32.partialorder %v259_v33, 0.0  ;;  %v263_v45 = vld [vmem:[%s1157_s30 + $0x3e8] sm:$0xff]  ;;  %767 = vst [vmem:[%s1172_s17 + $0x3a8] sm:$0xff] %v639_v42  ;;  %vm388_vm10 = vcmp.ge.f32.partialorder %v260_v37, 0.0 }
  0x9e   : > { %768 = vst [vmem:[%s1172_s17 + $0x3b0] sm:$0xff] %v640_v43  ;;  %v641_v46 = vsel %vm385_vm7, %v257_v28, %v513_v39  ;;  %v515_v47 = vmul.f32 0.15, %v259_v33  ;;  %v516_v48 = vmul.f32 0.15, %v260_v37  ;;  %v264_v49 = vld [vmem:[%s1157_s30 + $0x3f0] sm:$0xff] }
  0x9f   : > { %769 = vst [vmem:[%s1172_s17 + $0x3b8] sm:$0xff] %v641_v46  ;;  %v642_v50 = vsel %vm386_vm8, %v258_v29, %v514_v44  ;;  %vm389_vm11 = vcmp.ge.f32.partialorder %v261_v40, 0.0  ;;  %v517_v51 = vmul.f32 0.15, %v261_v40  ;;  %vm390_vm12 = vcmp.ge.f32.partialorder %v262_v41, 0.0  ;;  %v265_v52 = vld [vmem:[%s1157_s30 + $0x3f8] sm:$0xff] }
  0xa0   : > { %s793_s27 = sshll.u32 %s1172_s17, 4  ;;  %770 = vst [vmem:[%s1172_s17 + $0x3c0] sm:$0xff] %v642_v50  ;;  %v643_v53 = vsel %vm387_vm9, %v259_v33, %v515_v47  ;;  %v644_v54 = vsel %vm388_vm10, %v260_v37, %v516_v48  ;;  %v518_v55 = vmul.f32 0.15, %v262_v41  ;;  %vm391_vm13 = vcmp.ge.f32.partialorder %v263_v45, 0.0  ;;  %s779_s3 = scalar_lea.sflag [#allocation4], %s1153_s23  ;;  %s1485_s27 = int_to_ptr.vmem [resolvable:$true] %s793_s27 }
  0xa1   : > { %771 = vst [vmem:[%s1172_s17 + $0x3c8] sm:$0xff] %v643_v53  ;;  %772 = vst [vmem:[%s1172_s17 + $0x3d0] sm:$0xff] %v644_v54  ;;  %v645_v56 = vsel %vm389_vm11, %v261_v40, %v517_v51  ;;  %v519_v57 = vmul.f32 0.15, %v263_v45  ;;  %vm392_vm14 = vcmp.ge.f32.partialorder %v264_v49, 0.0  ;;  %vm393_vm15 = vcmp.ge.f32.partialorder %v265_v52, 0.0 }
  0xa2   : > { %v520_v58 = vmul.f32 0.15, %v264_v49  ;;  %773 = vst [vmem:[%s1172_s17 + $0x3d8] sm:$0xff] %v645_v56  ;;  %v646_v59 = vsel %vm390_vm12, %v262_v41, %v518_v55  ;;  %v521_v60 = vmul.f32 0.15, %v265_v52  ;;  %s966_s4 = scalar_lea.vmem %s1485_s27, 16384 }
  0xa3   : > { %774 = vst [vmem:[%s1172_s17 + $0x3e0] sm:$0xff] %v646_v59  ;;  %v647_v61 = vsel %vm391_vm13, %v263_v45, %v519_v57  ;;  %p967_p6 = scmp.ne.s32.totalorder %s1485_s27, %s966_s4  ;;  %p1540_p10 = scmp.ne.s32.totalorder %s1537_s18, 0 }
  0xa4   : > { %v648_v62 = vsel %vm392_vm14, %v264_v49, %v520_v58  ;;  %775 = vst [vmem:[%s1172_s17 + $0x3e8] sm:$0xff] %v647_v61  ;;  %v649_v63 = vsel %vm393_vm15, %v265_v52, %v521_v60  ;;  %s1037_s10 = smov [#allocation5]  }
  0xa5   : > { %776 = vst [vmem:[%s1172_s17 + $0x3f0] sm:$0xff] %v648_v62  ;;  %777 = vst [vmem:[%s1172_s17 + $0x3f8] sm:$0xff] %v649_v63  ;;  %p968_p11 = pnand %p967_p6, %p1540_p10  ;;  %s970_s5 = sshll.u32 %s1037_s10, 4  ;;  %s971_s5 = int_to_ptr.vmem [resolvable:$false] %s970_s5 }
  0xa6   : > { %s972_s11 = scalar_lea.vmem %s971_s5, 32768  ;;  %p973_p8 = scmp.lt.s32.totalorder %s1485_s27, %s971_s5 }
  0xa7   : > { %p969_p12 = pneg %p968_p11  ;;  %p974_p9 = scmp.lt.s32.totalorder %s972_s11, %s966_s4 }
  0xa9   : > { %p975_p13 = por %p974_p9, %p973_p8 }
  0xab   : > { %p976_p1 = pnand %p975_p13, %p969_p12 }
  0xad   : > { %979 = shalt.err (!%p976_p1)
}
  0xae   : > { %s980_s13 = scalar_lea.hbm %s1483_s2, 16384  ;;  %s984_s20 = scalar_lea.hbm %s1533_s1, 65536 }
  0xaf   : > { %p981_p3 = scmp.ne.s32.totalorder %s1483_s2, %s980_s13  ;;  %p985_p0 = scmp.lt.u32.totalorder %s1483_s2, %s1533_s1 }
  0xb0   : > { %p986_p2 = scmp.lt.u32.totalorder %s984_s20, %s980_s13  ;;  %p988_p6 = scmp.lt.u32.totalorder %s980_s13, %s1483_s2 }
  0xb1   : > { %p982_p4 = pnand %p981_p3, %p1540_p10 }
  0xb2   : > { %p987_p7 = por %p986_p2, %p985_p0 }
  0xb3   : > { %p983_p5 = pneg %p982_p4 }
  0xb4   : > { %p989_p11 = por %p988_p6, %p987_p7 }
  0xb6   : > { %p990_p12 = pnand %p989_p11, %p983_p5 }
  0xb8   : > { %993 = shalt.err (!%p990_p12)
}
  0xb9   : > { %s1038_s24 = smov 1024   ;;  %s1039_s26 = smov 64  }
  0xba   : > { %888 = dma.vmem_to_hbm [thread:$0]  (%p1540_p10), %s1485_s27, 16384, %s1483_s2, %s779_s3, %s1038_s24, %s1038_s24, %s1039_s26  }
  0xbb PF: > { %p899_p8 = scmp.ge.s32.totalorder %s1032_s9, 2  ;;  %s808_s30 = sand.u32 1, %s1020_s6  }
  0xbc   : > { %p1541_p9 = scmp.ne.s32.totalorder %s1538_s19, 0  ;;  %s809_s17 = scalar_lea.sflag [#allocation4], %s808_s30 }
  0xbe   : > { %p895_p13 = pnand %p899_p8, %p1541_p9 }
  0xc0   : > { %1015 = dma.done.wait (!%p895_p13), %s809_s17, 16384  }
  0xc1   : > { %1017 = vsyncadd (!%p895_p13), %s809_s17, 4294950912  ;;  %p14_p1 = scmp.ge.s32.totalorder %s1075_s12, 6   ;;  %s1542_s6 = smov %s1024_s7 }
  0xc2   : > { %s1543_s7 = smov %s1028_s8  ;;  %s1544_s8 = smov %s1087_s15 }
  0xc3   : > { %s1545_s9 = smov %s1075_s12  ;;  %16 = sbr.rel (!%p14_p1) target bundleno = 5 (0x5), region = 69 }
  0xca   :  { %814 = vsyncpa [#allocation3], 1 }
  0xcb   :  { %816 = vsyncpa [#allocation3 + $0x1], 1 }
  0xcc   :  { %817 = vsyncpa [#allocation4], 1 }
  0xcd   :  { %819 = vsyncpa [#allocation4 + $0x1], 1 }

</bundles_post_ra>
